<compile_context>
chip_gen: v7x
topology: tpu7x:2x2x1
jax: 0.10.0
libtpu: 0.0.40
codegen_flags: <defaults>
</compile_context>

<pallas_src>
import functools
import math

import jax
import jax.numpy as jnp
from jax.experimental import pallas as pl
from jax.experimental.pallas import tpu as pltpu


# ----------------------------------------------------------------------------
# Shared numerics (used by both the Pallas kernels and the pure-JAX reference,
# so the correctness check compares identical formulas).
# ----------------------------------------------------------------------------
def _layer_norm(x, gamma, beta, eps=1e-5):
    mu = jnp.mean(x, axis=-1, keepdims=True)
    var = jnp.mean(jnp.square(x - mu), axis=-1, keepdims=True)
    return (x - mu) * jax.lax.rsqrt(var + eps) * gamma + beta


def _softmax_last(x):
    x = x - jnp.max(x, axis=-1, keepdims=True)
    e = jnp.exp(x)
    return e / jnp.sum(e, axis=-1, keepdims=True)


def _quick_gelu(x):
    return x * jax.nn.sigmoid(1.702 * x)


def _mm3(x, w):
    """(B, S, Din) @ (Din, Dout) via a 2-D MXU matmul (reshape keeps lanes intact)."""
    b, s, din = x.shape
    y = jnp.dot(x.reshape(b * s, din), w, preferred_element_type=jnp.float32)
    return y.reshape(b, s, w.shape[1])


def _attention_block_math(x, ln1g, ln1b, wqkv, bqkv, wo, bo,
                          ln2g, ln2b, w1, b1, w2, b2, *, n_heads):
    """One CLIP residual attention block (causal MHA + QuickGELU MLP), batch-first."""
    bc, s, d = x.shape
    dh = d // n_heads
    scale = 1.0 / math.sqrt(dh)

    # ---- multi-head self-attention ----
    h = _layer_norm(x, ln1g, ln1b)
    qkv = _mm3(h, wqkv) + bqkv
    q, k, v = qkv[..., :d], qkv[..., d:2 * d], qkv[..., 2 * d:]

    rows = jax.lax.broadcasted_iota(jnp.int32, (s, s), 0)
    cols = jax.lax.broadcasted_iota(jnp.int32, (s, s), 1)
    causal = jnp.where(cols <= rows, 0.0, -1e9).astype(x.dtype)  # hoisted out of head loop

    heads = []
    for hh in range(n_heads):
        sl = slice(hh * dh, (hh + 1) * dh)
        sc = jnp.einsum('bqd,bkd->bqk', q[..., sl], k[..., sl],
                        preferred_element_type=jnp.float32) * scale + causal
        p = _softmax_last(sc)
        heads.append(jnp.einsum('bqk,bkd->bqd', p, v[..., sl],
                                preferred_element_type=jnp.float32))
    attn = jnp.concatenate(heads, axis=-1)
    x = x + (_mm3(attn, wo) + bo)

    # ---- MLP (QuickGELU, as in CLIP) ----
    h2 = _layer_norm(x, ln2g, ln2b)
    m = _quick_gelu(_mm3(h2, w1) + b1)
    x = x + (_mm3(m, w2) + b2)
    return x


# ----------------------------------------------------------------------------
# Kernel 1: PromptLearner.forward()  --  prompts = [prefix | ctx | suffix]
# ----------------------------------------------------------------------------
def _prompt_assemble_kernel(prefix_ref, ctx_ref, suffix_ref, out_ref):
    # prefix_ref : (BC, 1, D)      per-class SOS embeddings
    # ctx_ref    : (n_ctx, D)      shared learned context (resident: constant block)
    # suffix_ref : (BC, n_suf, D)  per-class class-name + EOS embeddings
    # out_ref    : (BC, L, D)      L = 1 + n_ctx + n_suf
    bc = prefix_ref.shape[0]
    n_ctx, d = ctx_ref.shape
    # One broadcast per grid step (never per class); explicit dtype cast.
    ctx_b = jnp.broadcast_to(ctx_ref[...][None, :, :],
                             (bc, n_ctx, d)).astype(out_ref.dtype)
    # Build the whole block in registers -> single aligned full-block store
    # (no sublane-misaligned masked partial stores).
    out_ref[...] = jnp.concatenate(
        [prefix_ref[...].astype(out_ref.dtype), ctx_b,
         suffix_ref[...].astype(out_ref.dtype)],
        axis=1)


def prompt_learner_forward(token_prefix, ctx, token_suffix, *, block_classes=8):
    n_cls, _, d = token_prefix.shape
    n_ctx = ctx.shape[0]
    n_suf = token_suffix.shape[1]
    seq = 1 + n_ctx + n_suf
    dtype = token_prefix.dtype
    block_classes = min(block_classes, n_cls)
    assert n_cls % block_classes == 0
    grid = (n_cls // block_classes,)
    return pl.pallas_call(
        _prompt_assemble_kernel,
        out_shape=jax.ShapeDtypeStruct((n_cls, seq, d), dtype),
        grid_spec=pltpu.PrefetchScalarGridSpec(
            num_scalar_prefetch=0,
            grid=grid,
            in_specs=[
                pl.BlockSpec((block_classes, 1, d), lambda c: (c, 0, 0)),
                pl.BlockSpec((n_ctx, d), lambda c: (0, 0)),          # shared, stays resident
                pl.BlockSpec((block_classes, n_suf, d), lambda c: (c, 0, 0)),
            ],
            out_specs=pl.BlockSpec((block_classes, seq, d), lambda c: (c, 0, 0)),
        ),
        compiler_params=pltpu.CompilerParams(
            dimension_semantics=("parallel",)),   # v7x: split class blocks over 2 TCs
    )(token_prefix, ctx, token_suffix)


# ----------------------------------------------------------------------------
# Kernel 2: x = prompts + positional_embedding
# ----------------------------------------------------------------------------
def _add_pos_kernel(x_ref, pos_ref, out_ref):
    out_ref[...] = (x_ref[...] + pos_ref[...].astype(x_ref.dtype)).astype(out_ref.dtype)


def add_positional(x, pos, *, block_classes):
    n_cls, s, d = x.shape
    grid = (n_cls // block_classes,)
    return pl.pallas_call(
        _add_pos_kernel,
        out_shape=jax.ShapeDtypeStruct(x.shape, x.dtype),
        grid_spec=pltpu.PrefetchScalarGridSpec(
            num_scalar_prefetch=0,
            grid=grid,
            in_specs=[pl.BlockSpec((block_classes, s, d), lambda c: (c, 0, 0)),
                      pl.BlockSpec((s, d), lambda c: (0, 0))],
            out_specs=pl.BlockSpec((block_classes, s, d), lambda c: (c, 0, 0)),
        ),
        compiler_params=pltpu.CompilerParams(dimension_semantics=("parallel",)),
    )(x, pos)


# ----------------------------------------------------------------------------
# Kernel 3: one fused residual attention block (LN1 -> causal MHA -> +res ->
#           LN2 -> QuickGELU MLP -> +res), gridded over class blocks.
# ----------------------------------------------------------------------------
def _residual_block_kernel(n_heads, x_ref, *refs):
    *w_refs, out_ref = refs
    x = x_ref[...].astype(jnp.float32)
    ws = [r[...] for r in w_refs]
    out_ref[...] = _attention_block_math(x, *ws, n_heads=n_heads).astype(out_ref.dtype)


def residual_attention_block(x, layer_weights, *, n_heads, block_classes):
    n_cls, s, d = x.shape
    grid = (n_cls // block_classes,)
    x_spec = pl.BlockSpec((block_classes, s, d), lambda c: (c, 0, 0))
    # All weights are kept 2-D so every weight block is (full, full) and resident
    # across the class-block grid (constant index_map => no re-DMA).
    w_specs = [pl.BlockSpec(w.shape, lambda c: (0, 0)) for w in layer_weights]
    return pl.pallas_call(
        functools.partial(_residual_block_kernel, n_heads),
        out_shape=jax.ShapeDtypeStruct(x.shape, x.dtype),
        grid_spec=pltpu.PrefetchScalarGridSpec(
            num_scalar_prefetch=0,
            grid=grid,
            in_specs=[x_spec] + w_specs,
            out_specs=x_spec,
        ),
        compiler_params=pltpu.CompilerParams(dimension_semantics=("parallel",)),
    )(x, *layer_weights)


# ----------------------------------------------------------------------------
# Kernel 4: ln_final + gather EOT token (argmax index) + @ text_projection
# ----------------------------------------------------------------------------
def _text_head_kernel(eot_ref, x_ref, lng_ref, lnb_ref, proj_ref, out_ref, gather_vmem):
    # eot_ref: (n_cls,) int32 in SMEM (scalar prefetch); x_ref: (n_cls, S, D)
    n_cls = x_ref.shape[0]
    for c in range(n_cls):                       # static unrolled gather
        gather_vmem[pl.ds(c, 1), :] = x_ref[c, pl.ds(eot_ref[c], 1), :]
    xe = gather_vmem[...].astype(jnp.float32)    # (n_cls, D)
    h = _layer_norm(xe, lng_ref[...], lnb_ref[...])
    out_ref[...] = jnp.dot(h, proj_ref[...],
                           preferred_element_type=jnp.float32).astype(out_ref.dtype)


def text_head(x, eot_idx, lnf_g, lnf_b, proj):
    n_cls, s, d = x.shape
    p_dim = proj.shape[1]
    return pl.pallas_call(
        _text_head_kernel,
        out_shape=jax.ShapeDtypeStruct((n_cls, p_dim), x.dtype),
        grid_spec=pltpu.PrefetchScalarGridSpec(
            num_scalar_prefetch=1,               # eot indices -> SMEM
            grid=(1,),
            in_specs=[
                pl.BlockSpec((n_cls, s, d), lambda i, eot: (0, 0, 0)),
                pl.BlockSpec((1, d), lambda i, eot: (0, 0)),
                pl.BlockSpec((1, d), lambda i, eot: (0, 0)),
                pl.BlockSpec((d, p_dim), lambda i, eot: (0, 0)),
            ],
            out_specs=pl.BlockSpec((n_cls, p_dim), lambda i, eot: (0, 0)),
            scratch_shapes=[pltpu.VMEM((n_cls, d), x.dtype)],
        ),
        compiler_params=pltpu.CompilerParams(dimension_semantics=("arbitrary",)),
    )(eot_idx, x, lnf_g, lnf_b, proj)


# ----------------------------------------------------------------------------
# TextEncoder.forward (Pallas) and pure-JAX reference
# ----------------------------------------------------------------------------
def text_encoder_forward(prompts, tokenized_prompts, params, *, n_heads, block_classes=8):
    x = add_positional(prompts, params['pos_embed'], block_classes=block_classes)
    for layer in params['layers']:
        x = residual_attention_block(x, layer, n_heads=n_heads, block_classes=block_classes)
    # tiny per-class argmax done in the wrapper and fed to the kernel via scalar prefetch
    eot_idx = jnp.argmax(tokenized_prompts, axis=-1).astype(jnp.int32)
    return text_head(x, eot_idx, params['lnf_g'], params['lnf_b'], params['text_projection'])


def text_encoder_reference(prompts, tokenized_prompts, params, *, n_heads):
    x = prompts + params['pos_embed']
    for layer in params['layers']:
        x = _attention_block_math(x, *layer, n_heads=n_heads)
    xf = _layer_norm(x, params['lnf_g'], params['lnf_b'])
    eot = jnp.argmax(tokenized_prompts, axis=-1)
    return xf[jnp.arange(x.shape[0]), eot] @ params['text_projection']


# ----------------------------------------------------------------------------
if __name__ == "__main__":
    # Small deterministic shapes consistent with the module (CLIP-like, reduced):
    n_cls, n_ctx, seq_len, d_model = 16, 4, 16, 128
    n_heads, n_layers, proj_dim = 4, 2, 128
    n_suf = seq_len - 1 - n_ctx
    # Pick the class block for the generation's VMEM (v7x has 64 MiB vs 128 MiB
    # on v5e/v6e); at these demo sizes 8 classes/step is tiny either way.
    block_classes = 8
    assert d_model % n_heads == 0

    keys = iter(jax.random.split(jax.random.PRNGKey(0), 64))
    nk = lambda: next(keys)

    # ---- PromptLearner tensors (frozen token embeddings + learned ctx) ----
    ctx = (0.02 * jax.random.normal(nk(), (n_ctx, d_model))).astype(jnp.float32)
    token_prefix = (0.02 * jax.random.normal(nk(), (n_cls, 1, d_model))).astype(jnp.float32)
    token_suffix = (0.02 * jax.random.normal(nk(), (n_cls, n_suf, d_model))).astype(jnp.float32)

    # ---- synthetic TextEncoder parameters ----
    wstd = 1.0 / math.sqrt(d_model)

    def make_layer():
        return (
            (1.0 + 0.1 * jax.random.normal(nk(), (1, d_model))).astype(jnp.float32),      # ln1 gamma
            (0.1 * jax.random.normal(nk(), (1, d_model))).astype(jnp.float32),            # ln1 beta
            (wstd * jax.random.normal(nk(), (d_model, 3 * d_model))).astype(jnp.float32), # W_qkv
            (0.01 * jax.random.normal(nk(), (1, 3 * d_model))).astype(jnp.float32),       # b_qkv
            (wstd * jax.random.normal(nk(), (d_model, d_model))).astype(jnp.float32),     # W_out
            (0.01 * jax.random.normal(nk(), (1, d_model))).astype(jnp.float32),           # b_out
            (1.0 + 0.1 * jax.random.normal(nk(), (1, d_model))).astype(jnp.float32),      # ln2 gamma
            (0.1 * jax.random.normal(nk(), (1, d_model))).astype(jnp.float32),            # ln2 beta
            (wstd * jax.random.normal(nk(), (d_model, 4 * d_model))).astype(jnp.float32), # W_mlp1
            (0.01 * jax.random.normal(nk(), (1, 4 * d_model))).astype(jnp.float32),       # b_mlp1
            (wstd * jax.random.normal(nk(), (4 * d_model, d_model))).astype(jnp.float32), # W_mlp2
            (0.01 * jax.random.normal(nk(), (1, d_model))).astype(jnp.float32),           # b_mlp2
        )

    params = {
        'pos_embed': (0.02 * jax.random.normal(nk(), (seq_len, d_model))).astype(jnp.float32),
        'layers': [make_layer() for _ in range(n_layers)],
        'lnf_g': (1.0 + 0.1 * jax.random.normal(nk(), (1, d_model))).astype(jnp.float32),
        'lnf_b': (0.1 * jax.random.normal(nk(), (1, d_model))).astype(jnp.float32),
        'text_projection': (wstd * jax.random.normal(nk(), (d_model, proj_dim))).astype(jnp.float32),
    }

    # tokenized prompts: EOT token id (largest value) at a per-class position
    eot_pos = (1 + n_ctx + jnp.arange(n_cls, dtype=jnp.int32) % n_suf).astype(jnp.int32)
    tokenized_prompts = jnp.zeros((n_cls, seq_len), jnp.int32).at[
        jnp.arange(n_cls), eot_pos].set(49407)

    # ---- Pallas forward ----
    prompts = prompt_learner_forward(token_prefix, ctx, token_suffix,
                                     block_classes=block_classes)
    text_features = text_encoder_forward(prompts, tokenized_prompts, params,
                                         n_heads=n_heads, block_classes=block_classes)
    text_features = jax.block_until_ready(text_features)

    # ---- pure-JAX reference ----
    ctx_exp = jnp.broadcast_to(ctx[None], (n_cls, n_ctx, d_model))
    prompts_ref = jnp.concatenate([token_prefix, ctx_exp, token_suffix], axis=1)
    with jax.default_matmul_precision("highest"):
        feats_ref = text_encoder_reference(prompts_ref, tokenized_prompts, params,
                                           n_heads=n_heads)

    assert prompts.shape == (n_cls, seq_len, d_model)
    assert jnp.array_equal(prompts, prompts_ref), "prompt assembly mismatch"
    assert text_features.shape == (n_cls, proj_dim)
    max_err = float(jnp.max(jnp.abs(text_features - feats_ref)))
    assert jnp.allclose(text_features, feats_ref, rtol=2e-2, atol=2e-2), (
        f"text encoder mismatch, max abs err {max_err}")
    print("KERNEL_OK")
</pallas_src>

<mosaic_0001>
module attributes {stable_mosaic.version = 11 : i64} {
  func.func @_prompt_assemble_kernel(%arg0: i32, %arg1: memref<8x1x128xf32, #tpu.memory_space<vmem>>, %arg2: memref<4x128xf32, #tpu.memory_space<vmem>>, %arg3: memref<8x11x128xf32, #tpu.memory_space<vmem>>, %arg4: memref<8x16x128xf32, #tpu.memory_space<vmem>>) attributes {dimension_semantics = [#tpu.dimension_semantics<parallel>], iteration_bounds = array<i64: 2>, scalar_prefetch = 0 : i64, scratch_operands = 0 : i64, tpu.core_type = #tpu.core_type<tc>, window_params = [{transform_indices = @transform_0, window_bounds = array<i64: 8, 1, 128>}, {pipeline_mode = #tpu.pipeline_mode<synchronous>, transform_indices = @transform_1, window_bounds = array<i64: 4, 128>}, {transform_indices = @transform_2, window_bounds = array<i64: 8, 11, 128>}, {transform_indices = @transform_3, window_bounds = array<i64: 8, 16, 128>}]} {
    %c0 = arith.constant 0 : index
    %c0_0 = arith.constant 0 : index
    %0 = vector.load %arg2[%c0, %c0_0] : memref<4x128xf32, #tpu.memory_space<vmem>>, vector<4x128xf32>
    %1 = vector.shape_cast %0 : vector<4x128xf32> to vector<1x4x128xf32>
    %2 = vector.shape_cast %1 : vector<1x4x128xf32> to vector<1x4x128xf32>
    %3 = vector.broadcast %2 : vector<1x4x128xf32> to vector<8x4x128xf32>
    %c0_1 = arith.constant 0 : index
    %c0_2 = arith.constant 0 : index
    %c0_3 = arith.constant 0 : index
    %4 = vector.load %arg1[%c0_1, %c0_2, %c0_3] : memref<8x1x128xf32, #tpu.memory_space<vmem>>, vector<8x1x128xf32>
    %c0_4 = arith.constant 0 : index
    %c0_5 = arith.constant 0 : index
    %c0_6 = arith.constant 0 : index
    %5 = vector.load %arg3[%c0_4, %c0_5, %c0_6] : memref<8x11x128xf32, #tpu.memory_space<vmem>>, vector<8x11x128xf32>
    %6 = tpu.concatenate %4, %3, %5 in 1 : vector<8x1x128xf32>, vector<8x4x128xf32>, vector<8x11x128xf32> -> vector<8x16x128xf32>
    %c0_7 = arith.constant 0 : index
    %c0_8 = arith.constant 0 : index
    %c0_9 = arith.constant 0 : index
    %7 = vector.load %arg4[%c0_7, %c0_8, %c0_9] : memref<8x16x128xf32, #tpu.memory_space<vmem>>, vector<8x16x128xf32>
    tpu.vector_store %arg4[%c0_7, %c0_8, %c0_9], %6 {strides = array<i32>} : memref<8x16x128xf32, #tpu.memory_space<vmem>>, vector<8x16x128xf32>,
    return
  }
  func.func @transform_0(%arg0: i32) -> (i32, i32, i32) {
    %c0_i32 = arith.constant 0 : i32
    %c0_i32_0 = arith.constant 0 : i32
    %c0_i32_1 = arith.constant 0 : i32
    return %arg0, %c0_i32, %c0_i32_0 : i32, i32, i32
  }
  func.func @transform_1(%arg0: i32) -> (i32, i32) {
    %c0_i32 = arith.constant 0 : i32
    %c0_i32_0 = arith.constant 0 : i32
    %c0_i32_1 = arith.constant 0 : i32
    return %c0_i32, %c0_i32_0 : i32, i32
  }
  func.func @transform_2(%arg0: i32) -> (i32, i32, i32) {
    %c0_i32 = arith.constant 0 : i32
    %c0_i32_0 = arith.constant 0 : i32
    %c0_i32_1 = arith.constant 0 : i32
    return %arg0, %c0_i32, %c0_i32_0 : i32, i32, i32
  }
  func.func @transform_3(%arg0: i32) -> (i32, i32, i32) {
    %c0_i32 = arith.constant 0 : i32
    %c0_i32_0 = arith.constant 0 : i32
    %c0_i32_1 = arith.constant 0 : i32
    return %arg0, %c0_i32, %c0_i32_0 : i32, i32, i32
  }
}

</mosaic_0001>

<bundles_post_ra>
// kernel: tpu_custom_call.1
= control target key start
LH: loop header
LB: loop body
LE: loop exit
PB: predicated region body
PF: predicated region fallthrough
CT: control target
= control target key end

     0   :  { %8 = vsyncpa [#allocation3], 0  ;;  %s742_s0 = inlined_call_operand.vmem [shape: f32[16,1,128], index: 0, kind: input, shape index: {}]   ;;  %s743_s1 = inlined_call_operand.vmem [shape: f32[4,128], index: 1, kind: input, shape index: {}]   ;;  %s744_s2 = inlined_call_operand.vmem [shape: f32[16,11,128], index: 2, kind: input, shape index: {}]   ;;  %s745_s3 = inlined_call_operand.hbm [shape: f32[16,16,128], index: 3, kind: output, shape index: {}]  }
   0x1   :  { %10 = vsyncpa [#allocation3 + $0x1], 0  ;;  %s544_s12 = smov 0   ;;  %s546_s13 = smov 0  }
   0x2   :  { %s548_s14 = smov 0   ;;  %s550_s15 = smov 0  }
   0x3 LB: > { %s565_s16 = sadd.s32 4294967295, %s519_s15   ;;  %s398_s17 = sadd.s32 4294967294, %s519_s15   ;;  %s519_s15 = sphi %s550_s15, %s751_s15   ;;  %s515_s14 = sphi %s548_s14, %s750_s14   ;;  %s511_s13 = sphi %s546_s13, %s749_s13   ;;  %s507_s12 = sphi %s544_s12, %s748_s12  }
   0x4   : > { %s569_s18 = sadd.s32 1, %s519_s15   ;;  %s96_s19 = sadd.s32 1, %s515_s14 }
   0x5   : > { %s93_s20 = ssub.s32 %s519_s15, %s569_s18  ;;  %p106_p0 = scmp.ne.s32.totalorder %s515_s14, %s511_s13 }
   0x6   : > { %p94_p1 = scmp.eq.s32.totalorder %s93_s20, 0  ;;  %p107_p2 = scmp.eq.s32.totalorder %s565_s16, 1 }
   0x7   : > { %p112_p3 = scmp.ne.s32.totalorder %s511_s13, %s507_s12  ;;  %p113_p4 = scmp.eq.s32.totalorder %s398_s17, 1 }
   0x8   : > { %s580_s21 = scalar_select %p94_p1, %s515_s14, %s96_s19  }
   0x9   : > { %p582_p5 = por %p107_p2, %p106_p0  ;;  %p586_p6 = por %p113_p4, %p112_p3 }
   0xa   : > { %p401_p7 = scmp.ge.s32.totalorder %s519_s15, 1  ;;  %p152_p8 = scmp.lt.s32.totalorder %s519_s15, 3 }
   0xc   : > { %p153_p9 = pnand %p401_p7, %p152_p8 }
   0xd   : > { %s403_s24 = sshll.u32 (!%p153_p9), %s565_s16, 3  ;;  %v194_v0 = vld [vmem:[%s743_s1] sm:$0xf] (!%p153_p9)  ;;  %s178_s27 = sand.u32 (!%p153_p9), 1, %s511_s13   ;;  %vm279_vm0 = vcmask (!%p153_p9), 1040384   ;;  %vm238_vm1 = vcmask (!%p153_p9), 1044480  }
   0xe   : > { %156 = sbr.rel (%p153_p9) target bundleno = 52 (0x34), region = 32  ;;  %p182_p10 = scmp.lt.s32.totalorder (!%p153_p9), %s403_s24, 15  ;;  %v597_v1 = vrot.slane (!%p153_p9), %v194_v0, 7 }
   0xf   : > { %s601_s28 = sshll.u32 (!%p153_p9), %s178_s27, 7  ;;  %s415_s9 = sshll.u32 (!%p153_p9), %s565_s16, 11 }
  0x10   : > { %s637_s10 = scalar_lea.vmem (!%p153_p9), [#allocation2], %s601_s28  ;;  %s690_s20 = scalar_lea.hbm (!%p153_p9), %s745_s3, %s415_s9 }
  0x11   : > { %s327_s11 = sshll.u32 (!%p153_p9), %s637_s10, 4  ;;  %s521_s25 = smov (!%p153_p9), [#allocation2]   ;;  %s692_s11 = int_to_ptr.vmem [resolvable:$true] %s327_s11 }
  0x12   : > { %s457_s16 = scalar_lea.vmem (!%p153_p9), %s692_s11, 2048  ;;  %s461_s26 = sshll.u32 (!%p153_p9), %s521_s25, 4  ;;  %s462_s26 = int_to_ptr.vmem [resolvable:$false] %s461_s26 }
  0x13   : > { %p458_p11 = scmp.ne.s32.totalorder (!%p153_p9), %s692_s11, %s457_s16  ;;  %s463_s28 = scalar_lea.vmem (!%p153_p9), %s462_s26, 4096 }
  0x14   : > { %p464_p0 = scmp.lt.s32.totalorder (!%p153_p9), %s692_s11, %s462_s26  ;;  %p465_p1 = scmp.lt.s32.totalorder (!%p153_p9), %s463_s28, %s457_s16 }
  0x15   : > { %s753_s24 = smov (!%p182_p10, %s403_s24), 15  ;;  %p459_p12 = pnand %p458_p11, %p582_p5 }
  0x16   : > { %s606_s4 = scalar_lea.vmem %s742_s0, %s753_s24  ;;  %s413_s5 = sshll.u32 %s753_s24, 4 }
  0x17   : > { %s611_s8 = scalar_lea.vmem %s744_s2, %s413_s5  ;;  %v195_v2 = vld [vmem:[%s606_s4] sm:$0x1]  ;;  %v196_v3 = vld [vmem:[%s606_s4 + $0x1] sm:$0x1]  ;;  %v197_v4 = vld [vmem:[%s606_s4 + $0x2] sm:$0x1]  ;;  %p460_p13 = pneg %p459_p12 }
  0x18   : > { %v203_v5 = vld [vmem:[%s611_s8] sm:$0xff]  ;;  %v280_v6 = vsel %vm279_vm0, %v195_v2, %v597_v1  ;;  %v204_v7 = vld [vmem:[%s611_s8 + $0x8] sm:$0x7]  ;;  %v205_v8 = vld [vmem:[%s611_s8 + $0x10] sm:$0xff]  ;;  %v281_v9 = vsel %vm279_vm0, %v196_v3, %v597_v1  ;;  %v282_v15 = vsel %vm279_vm0, %v197_v4, %v597_v1  ;;  %s701_s24 = scalar_lea.sflag [#allocation3], %s178_s27  ;;  %p466_p2 = por %p465_p1, %p464_p0 }
  0x19   : > { %v239_v10 = vrot.slane %v203_v5, 3  ;;  %v240_v11 = vrot.slane %v204_v7, 3  ;;  %v242_v12 = vrot.slane %v205_v8, 3  ;;  %v206_v13 = vld [vmem:[%s611_s8 + $0x18] sm:$0x7]  ;;  %v207_v14 = vld [vmem:[%s611_s8 + $0x20] sm:$0xff] }
  0x1a   : > { %v243_v16 = vrot.slane %v206_v13, 3  ;;  %v245_v17 = vrot.slane %v207_v14, 3  ;;  %v208_v18 = vld [vmem:[%s611_s8 + $0x28] sm:$0x7]  ;;  %v198_v19 = vld [vmem:[%s606_s4 + $0x3] sm:$0x1]  ;;  %p467_p3 = pnand %p466_p2, %p460_p13 }
  0x1b   : > { %v288_v20 = vsel %vm238_vm1, %v280_v6, %v239_v10  ;;  %v241_v21 = vsel %vm238_vm1, %v239_v10, %v240_v11  ;;  %v289_v22 = vsel %vm238_vm1, %v281_v9, %v242_v12  ;;  %v246_v23 = vrot.slane %v208_v18, 3  ;;  %v209_v24 = vld [vmem:[%s611_s8 + $0x30] sm:$0xff]  ;;  %v210_v25 = vld [vmem:[%s611_s8 + $0x38] sm:$0x7]  ;;  %v199_v26 = vld [vmem:[%s606_s4 + $0x4] sm:$0x1] }
  0x1c   : > { %296 = vst [vmem:[%s637_s10] sm:$0xff] %v288_v20  ;;  %297 = vst [vmem:[%s637_s10 + $0x8] sm:$0xff] %v241_v21  ;;  %v244_v27 = vsel %vm238_vm1, %v242_v12, %v243_v16  ;;  %v290_v28 = vsel %vm238_vm1, %v282_v15, %v245_v17  ;;  %v248_v29 = vrot.slane %v209_v24, 3  ;;  %v283_v30 = vsel %vm279_vm0, %v198_v19, %v597_v1  ;;  %v211_v31 = vld [vmem:[%s611_s8 + $0x40] sm:$0xff]  ;;  %v212_v32 = vld [vmem:[%s611_s8 + $0x48] sm:$0x7] }
  0x1d   : > { %298 = vst [vmem:[%s637_s10 + $0x10] sm:$0xff] %v289_v22  ;;  %v200_v33 = vld [vmem:[%s606_s4 + $0x5] sm:$0x1]  ;;  %299 = vst [vmem:[%s637_s10 + $0x18] sm:$0xff] %v244_v27  ;;  %v247_v34 = vsel %vm238_vm1, %v245_v17, %v246_v23  ;;  %v249_v35 = vrot.slane %v210_v25, 3  ;;  %v251_v36 = vrot.slane %v211_v31, 3  ;;  %v284_v37 = vsel %vm279_vm0, %v199_v26, %v597_v1 }
  0x1e   : > { %300 = vst [vmem:[%s637_s10 + $0x20] sm:$0xff] %v290_v28  ;;  %v213_v38 = vld [vmem:[%s611_s8 + $0x50] sm:$0xff]  ;;  %v214_v39 = vld [vmem:[%s611_s8 + $0x58] sm:$0x7]  ;;  %v215_v40 = vld [vmem:[%s611_s8 + $0x60] sm:$0xff]  ;;  %v291_v41 = vsel %vm238_vm1, %v283_v30, %v248_v29  ;;  %v252_v42 = vrot.slane %v212_v32, 3  ;;  %v285_v44 = vsel %vm279_vm0, %v200_v33, %v597_v1 }
  0x1f   : > { %301 = vst [vmem:[%s637_s10 + $0x28] sm:$0xff] %v247_v34  ;;  %v254_v43 = vrot.slane %v213_v38, 3  ;;  %v201_v45 = vld [vmem:[%s606_s4 + $0x6] sm:$0x1]  ;;  %v216_v46 = vld [vmem:[%s611_s8 + $0x68] sm:$0x7]  ;;  %v250_v47 = vsel %vm238_vm1, %v248_v29, %v249_v35  ;;  %v292_v48 = vsel %vm238_vm1, %v284_v37, %v251_v36 }
  0x20   : > { %302 = vst [vmem:[%s637_s10 + $0x30] sm:$0xff] %v291_v41  ;;  %v255_v49 = vrot.slane %v214_v39, 3  ;;  %v257_v50 = vrot.slane %v215_v40, 3  ;;  %v202_v51 = vld [vmem:[%s606_s4 + $0x7] sm:$0x1]  ;;  %v217_v52 = vld [vmem:[%s611_s8 + $0x70] sm:$0xff]  ;;  %v253_v53 = vsel %vm238_vm1, %v251_v36, %v252_v42  ;;  %v286_v55 = vsel %vm279_vm0, %v201_v45, %v597_v1 }
  0x21   : > { %303 = vst [vmem:[%s637_s10 + $0x38] sm:$0xff] %v250_v47  ;;  %304 = vst [vmem:[%s637_s10 + $0x40] sm:$0xff] %v292_v48  ;;  %v293_v54 = vsel %vm238_vm1, %v285_v44, %v254_v43  ;;  %v258_v56 = vrot.slane %v216_v46, 3  ;;  %v218_v57 = vld [vmem:[%s611_s8 + $0x78] sm:$0x7]  ;;  %v260_v60 = vrot.slane %v217_v52, 3  ;;  %v287_v61 = vsel %vm279_vm0, %v202_v51, %v597_v1 }
  0x22   : > { %305 = vst [vmem:[%s637_s10 + $0x48] sm:$0xff] %v253_v53  ;;  %306 = vst [vmem:[%s637_s10 + $0x50] sm:$0xff] %v293_v54  ;;  %v256_v58 = vsel %vm238_vm1, %v254_v43, %v255_v49  ;;  %v294_v59 = vsel %vm238_vm1, %v286_v55, %v257_v50  ;;  %v261_v63 = vrot.slane %v218_v57, 3 }
  0x23   : > { %307 = vst [vmem:[%s637_s10 + $0x58] sm:$0xff] %v256_v58  ;;  %308 = vst [vmem:[%s637_s10 + $0x60] sm:$0xff] %v294_v59  ;;  %v259_v62 = vsel %vm238_vm1, %v257_v50, %v258_v56  ;;  %v295_v0 = vsel %vm238_vm1, %v287_v61, %v260_v60 }
  0x24   : > { %309 = vst [vmem:[%s637_s10 + $0x68] sm:$0xff] %v259_v62  ;;  %310 = vst [vmem:[%s637_s10 + $0x70] sm:$0xff] %v295_v0  ;;  %v262_v1 = vsel %vm238_vm1, %v260_v60, %v261_v63 }
  0x25   : > { %311 = vst [vmem:[%s637_s10 + $0x78] sm:$0xff] %v262_v1 }
  0x26   : > { %470 = shalt.err (!%p467_p3)
}
  0x27   : > { %s471_s27 = scalar_lea.hbm %s690_s20, 2048  ;;  %s475_s4 = scalar_lea.hbm %s745_s3, 4096 }
  0x28   : > { %p472_p4 = scmp.ne.s32.totalorder %s690_s20, %s471_s27  ;;  %p476_p9 = scmp.lt.u32.totalorder %s690_s20, %s745_s3 }
  0x29   : > { %p477_p10 = scmp.lt.u32.totalorder %s475_s4, %s471_s27  ;;  %p479_p12 = scmp.lt.u32.totalorder %s471_s27, %s690_s20 }
  0x2a   : > { %p473_p7 = pnand %p472_p4, %p582_p5 }
  0x2b   : > { %p478_p11 = por %p477_p10, %p476_p9 }
  0x2c   : > { %p474_p8 = pneg %p473_p7 }
  0x2d   : > { %p480_p13 = por %p479_p12, %p478_p11 }
  0x2f   : > { %p481_p0 = pnand %p480_p13, %p474_p8 }
  0x31   : > { %484 = shalt.err (!%p481_p0)
}
  0x32   : > { %s522_s7 = smov 128   ;;  %s523_s8 = smov 8  }
  0x33   : > { %416 = dma.vmem_to_hbm [thread:$0]  (%p582_p5), %s692_s11, 2048, %s690_s20, %s701_s24, %s522_s7, %s522_s7, %s523_s8  }
  0x34 PF: > { %p422_p1 = scmp.ge.s32.totalorder %s519_s15, 2  ;;  %s342_s9 = sand.u32 1, %s507_s12  }
  0x35   : > { %s343_s10 = scalar_lea.sflag [#allocation3], %s342_s9 }
  0x36   : > { %p419_p2 = pnand %p422_p1, %p586_p6 }
  0x38   : > { %502 = dma.done.wait (!%p419_p2), %s343_s10, 2048  }
  0x39   : > { %504 = vsyncadd (!%p419_p2), %s343_s10, 4294965248  ;;  %p13_p3 = scmp.ge.s32.totalorder %s569_s18, 4   ;;  %s748_s12 = smov %s511_s13 }
  0x3a   : > { %s749_s13 = smov %s515_s14  ;;  %s750_s14 = smov %s580_s21 }
  0x3b   : > { %s751_s15 = smov %s569_s18  ;;  %15 = sbr.rel (!%p13_p3) target bundleno = 3 (0x3), region = 70 }
  0x42   :  { %348 = vsyncpa [#allocation3], 1 }
  0x43   :  { %350 = vsyncpa [#allocation3 + $0x1], 1 }

</bundles_post_ra>
